<compile_context>
chip_gen: v5e
topology: v5e:2x2
jax: 0.10.0
libtpu: 0.0.40
codegen_flags: <defaults>
</compile_context>

<pallas_src>
import math

import jax
import jax.numpy as jnp
from jax import lax
from jax.experimental import pallas as pl
from jax.experimental.pallas import tpu as pltpu

# ---- small, module-consistent hyper-parameters ------------------------------
VOCAB = 256     # vocab_size
EMB = 64        # embedding_size
ENC = 64        # enc_dim (n_encoding_layers = 1, n_covars = 0)
NLAT = 32       # latent_distribution.n_latent
BATCH = 16      # per-branch batch
BN_EPS = 1e-3
ALPHA = 1.0
PRIOR_VAR = 1.0 / ALPHA - 2.0 / NLAT + 1.0 / (NLAT * NLAT)
PRIOR_LOGVAR = math.log(PRIOR_VAR)
INV_PV = 1.0 / PRIOR_VAR
KLD_WT = 1.0            # MetricBowVAEModel.kld_wt
REDUNDANCY_PEN = 0.1    # redundancy_reg_penalty
NORM_EPS = 1e-12        # guards 0/0 in the redundancy norms

# packed lane-dense (TB, 128) output slab layout (mu is lane-aligned at 0)
OUT_W = 128
COL_MU = 0              # lanes [0, NLAT)
COL_ELBO = NLAT         # 32
COL_REC = NLAT + 1      # 33
COL_KL = NLAT + 2       # 34


def _softplus(x):
    # numerically stable softplus, matches torch.nn.Softplus
    return jnp.maximum(x, 0.0) + jnp.log1p(jnp.exp(-jnp.abs(x)))


# ----------------------------- fused VAE kernel -------------------------------
def _bow_vae_kernel(data_ref, eps_ref,
                    w_emb_ref, b_emb_ref,
                    w_enc_ref, b_enc_ref,
                    w_mulv_ref, b_mulv_ref,
                    w_dec_ref, b_dec_ref,
                    out_ref):
    data_bf = data_ref[...]                            # (TB, V) bf16
    data = data_bf.astype(jnp.float32)                 # f32 copy for the loss
    tb = data.shape[0]

    # embedding: Linear(V->E) + tanh   (bf16 MXU, f32 accumulation)
    emb = jnp.tanh(jnp.dot(data_bf, w_emb_ref[...],
                           preferred_element_type=jnp.float32) + b_emb_ref[...])
    # encoder layer: Linear(E->H) + softplus   (dropout = identity in eval mode)
    h = _softplus(jnp.dot(emb, w_enc_ref[...],
                          preferred_element_type=jnp.float32) + b_enc_ref[...])

    # fused latent projection with eval-BN already folded in: [mu | logvar]
    mulv = jnp.dot(h, w_mulv_ref[...],
                   preferred_element_type=jnp.float32) + b_mulv_ref[...]
    mu = mulv[:, :NLAT]                                 # (TB, K)
    lv = mulv[:, NLAT:]                                 # (TB, K)

    # reparameterised sample -> simplex (std reused for the KL variance term)
    std = jnp.exp(0.5 * lv)
    zp = mu + std * eps_ref[...]
    zm = jnp.max(zp, axis=-1, keepdims=True)
    ze = jnp.exp(zp - zm)
    z = ze * pl.reciprocal(jnp.sum(ze, axis=-1, keepdims=True), approx=True)

    # KL(q || logistic-normal prior); std*std replaces a second exp(lv)
    kl = 0.5 * (jnp.sum((std * std + mu * mu) * INV_PV - lv,
                        axis=1, keepdims=True)
                + NLAT * PRIOR_LOGVAR - float(NLAT))
    klw = kl * KLD_WT

    # decoder (bf16 MXU) + exact log-softmax reconstruction loss with a single
    # fused vocab-length reduction: rec = sum(data * (lse - xhat))
    xhat = jnp.dot(z.astype(jnp.bfloat16), w_dec_ref[...],
                   preferred_element_type=jnp.float32) + b_dec_ref[...]
    xm = jnp.max(xhat, axis=-1, keepdims=True)
    lse = xm + jnp.log(jnp.sum(jnp.exp(xhat - xm), axis=-1, keepdims=True))
    rec = jnp.sum(data * (lse - xhat), axis=1, keepdims=True)

    elbo = rec + klw

    # lane-aligned output slab: mu at lanes [0,32), scalars selected in place
    # at lanes 32..34 (no lane rotates), one dense 128-lane store.
    lane = lax.broadcasted_iota(jnp.int32, (tb, OUT_W), 1)
    slab = jnp.concatenate(
        [mu, jnp.zeros((tb, OUT_W - NLAT), jnp.float32)], axis=1)
    slab = jnp.where(lane == COL_ELBO, elbo, slab)
    slab = jnp.where(lane == COL_REC, rec, slab)
    slab = jnp.where(lane == COL_KL, klw, slab)
    out_ref[...] = slab


# ------------------------------ wrapper ---------------------------------------
def _pick_tb(bt):
    # Split the batch across the grid ONLY on dual-TensorCore parts (v7x); on
    # 1-TC chips (v5e/v6e) the grid is a sequential loop, so one big tile wins.
    try:
        kind = jax.devices()[0].device_kind.lower()
    except Exception:
        kind = ""
    dual_tc = ("v7" in kind) or ("7x" in kind)
    if dual_tc and bt % 2 == 0 and (bt // 2) % 16 == 0:
        return bt // 2
    return bt


def _fold_bn(w, b, bn):
    # eval-mode BatchNorm1d folded into the preceding Linear (bit-exact).
    gamma, beta, rm, rv = bn[0], bn[1], bn[2], bn[3]
    scale = gamma * lax.rsqrt(rv + BN_EPS)
    shift = beta - rm * scale
    return w * scale[None, :], b * scale[None, :] + shift[None, :]


def _redundancy(w_dec, w_emb):
    # CoherenceRegularizer 'D' (diversity) term. Weight-only, so it is computed
    # exactly once per forward here (plain XLA, f32) instead of per grid tile /
    # per TensorCore inside the Pallas kernel (perf-review item #1).
    wmin = jnp.min(w_dec, axis=1, keepdims=True)
    ww = w_dec - wmin
    w_norm = ww * lax.rsqrt(jnp.sum(ww * ww, axis=1, keepdims=True) + NORM_EPS)
    emb_inv = lax.rsqrt(jnp.sum(w_emb * w_emb, axis=0, keepdims=True) + NORM_EPS)
    tt = jnp.dot(w_norm, w_emb) * emb_inv                      # (K, E)
    t_norm = tt * lax.rsqrt(jnp.sum(tt * tt, axis=1, keepdims=True) + NORM_EPS)
    csum = jnp.sum(t_norm, axis=0)                              # (E,)
    return REDUNDANCY_PEN * jnp.sum(csum * csum)                # scalar


@jax.jit
def metric_bow_vae_forward(params, data1, data2, eps1, eps2):
    B = data1.shape[0]
    # both VAE branches fused into one pallas_call via batch concatenation;
    # bag-of-words counts are small ints -> exact in bf16 (MXU-native dtype).
    data = jnp.concatenate([data1, data2], axis=0).astype(jnp.bfloat16)
    eps = jnp.concatenate([eps1, eps2], axis=0).astype(jnp.float32)
    bt = data.shape[0]

    w_mu_f, b_mu_f = _fold_bn(params["w_mu"], params["b_mu"], params["bn_mu"])
    w_lv_f, b_lv_f = _fold_bn(params["w_lv"], params["b_lv"], params["bn_lv"])
    w_mulv = jnp.concatenate([w_mu_f, w_lv_f], axis=1)   # (ENC, 2*NLAT)
    b_mulv = jnp.concatenate([b_mu_f, b_lv_f], axis=1)   # (1, 2*NLAT)

    # vocab-dimension matmul operands go in as bf16 (halves their DMA bytes)
    w_emb_bf = params["w_emb"].astype(jnp.bfloat16)
    w_dec_bf = params["w_dec"].astype(jnp.bfloat16)

    tb = _pick_tb(bt)
    grid = (bt // tb,)

    def full2d(shape):
        # constant-index weight/bias blocks; with grid=(1,) on 1-TC chips the
        # pipeline is a single step so double-buffering them is moot.
        return pl.BlockSpec(shape, lambda i: (0, 0))

    in_specs = [
        pl.BlockSpec((tb, VOCAB), lambda i: (i, 0)),      # data (bf16)
        pl.BlockSpec((tb, NLAT), lambda i: (i, 0)),       # eps  (f32)
        full2d((VOCAB, EMB)), full2d((1, EMB)),           # embedding (bf16/f32)
        full2d((EMB, ENC)), full2d((1, ENC)),             # encoder
        full2d((ENC, 2 * NLAT)), full2d((1, 2 * NLAT)),   # fused mu|lv (+BN)
        full2d((NLAT, VOCAB)), full2d((1, VOCAB)),        # decoder (bf16/f32)
    ]
    out_spec = pl.BlockSpec((tb, OUT_W), lambda i: (i, 0))

    # TODO(synk): at realistic TMNT vocab sizes (2k-50k) add a vocab grid axis,
    # stream the (tb,V)/(V,E)/(K,V) tiles, and set vmem_limit_bytes explicitly
    # (v7x's 64 MiB VMEM hits the wall first). At VOCAB=256 defaults are fine.
    slab = pl.pallas_call(
        _bow_vae_kernel,
        out_shape=jax.ShapeDtypeStruct((bt, OUT_W), jnp.float32),
        grid_spec=pltpu.PrefetchScalarGridSpec(
            num_scalar_prefetch=0, grid=grid,
            in_specs=in_specs, out_specs=out_spec),
        compiler_params=pltpu.CompilerParams(
            dimension_semantics=("parallel",)),
    )(data, eps,
      w_emb_bf, params["b_emb"],
      params["w_enc"], params["b_enc"],
      w_mulv, b_mulv,
      w_dec_bf, params["b_dec"])

    s1, s2 = slab[:B], slab[B:]
    elbo = s1[:, COL_ELBO] + s2[:, COL_ELBO]
    rec = s1[:, COL_REC] + s2[:, COL_REC]
    kl = s1[:, COL_KL] + s2[:, COL_KL]
    redundancy = _redundancy(params["w_dec"], params["w_emb"])
    mu1 = s1[:, COL_MU:COL_MU + NLAT]
    mu2 = s2[:, COL_MU:COL_MU + NLAT]
    return elbo, rec, kl, redundancy, mu1, mu2


# ------------------------------ parameters ------------------------------------
def init_params(key):
    def xavier(k, shape):
        fan_in, fan_out = shape
        bound = math.sqrt(6.0 / (fan_in + fan_out))
        return jax.random.uniform(k, shape, jnp.float32, -bound, bound)

    ks = jax.random.split(key, 5)
    bn_default = jnp.stack([jnp.ones((NLAT,)), jnp.zeros((NLAT,)),
                            jnp.zeros((NLAT,)), jnp.ones((NLAT,))]).astype(jnp.float32)
    return {
        "w_emb": xavier(ks[0], (VOCAB, EMB)), "b_emb": jnp.zeros((1, EMB), jnp.float32),
        "w_enc": xavier(ks[1], (EMB, ENC)), "b_enc": jnp.zeros((1, ENC), jnp.float32),
        "w_mu": xavier(ks[2], (ENC, NLAT)), "b_mu": jnp.zeros((1, NLAT), jnp.float32),
        "w_lv": xavier(ks[3], (ENC, NLAT)), "b_lv": jnp.zeros((1, NLAT), jnp.float32),
        "w_dec": xavier(ks[4], (NLAT, VOCAB)), "b_dec": jnp.zeros((1, VOCAB), jnp.float32),
        "bn_mu": bn_default, "bn_lv": bn_default,
    }


if __name__ == "__main__":
    root = jax.random.PRNGKey(0)
    kp, k1, k2, ke1, ke2 = jax.random.split(root, 5)
    params = init_params(kp)

    # bag-of-words count vectors (B, V)
    data1 = jax.random.randint(k1, (BATCH, VOCAB), 0, 3).astype(jnp.float32)
    data2 = jax.random.randint(k2, (BATCH, VOCAB), 0, 3).astype(jnp.float32)
    # reparameterisation noise (the torch.randn in the latent distribution)
    eps1 = jax.random.normal(ke1, (BATCH, NLAT), jnp.float32)
    eps2 = jax.random.normal(ke2, (BATCH, NLAT), jnp.float32)

    outs = metric_bow_vae_forward(params, data1, data2, eps1, eps2)
    outs = jax.block_until_ready(outs)
    elbo, rec, kl, red, mu1, mu2 = outs
    assert elbo.shape == (BATCH,) and rec.shape == (BATCH,) and kl.shape == (BATCH,)
    assert mu1.shape == (BATCH, NLAT) and mu2.shape == (BATCH, NLAT)
    assert red.shape == ()
    assert all(bool(jnp.all(jnp.isfinite(x))) for x in (elbo, rec, kl, mu1, mu2))
    assert bool(jnp.isfinite(red))
    print("KERNEL_OK")
</pallas_src>

<mosaic_0001>
module attributes {stable_mosaic.version = 11 : i64} {
  func.func @_bow_vae_kernel(%arg0: i32, %arg1: memref<32x256xbf16, #tpu.memory_space<vmem>>, %arg2: memref<32x32xf32, #tpu.memory_space<vmem>>, %arg3: memref<256x64xbf16, #tpu.memory_space<vmem>>, %arg4: memref<1x64xf32, #tpu.memory_space<vmem>>, %arg5: memref<64x64xf32, #tpu.memory_space<vmem>>, %arg6: memref<1x64xf32, #tpu.memory_space<vmem>>, %arg7: memref<64x64xf32, #tpu.memory_space<vmem>>, %arg8: memref<1x64xf32, #tpu.memory_space<vmem>>, %arg9: memref<32x256xbf16, #tpu.memory_space<vmem>>, %arg10: memref<1x256xf32, #tpu.memory_space<vmem>>, %arg11: memref<32x128xf32, #tpu.memory_space<vmem>>) attributes {dimension_semantics = [#tpu.dimension_semantics<parallel>], iteration_bounds = array<i64: 1>, scalar_prefetch = 0 : i64, scratch_operands = 0 : i64, tpu.core_type = #tpu.core_type<tc>, window_params = [{transform_indices = @transform_0, window_bounds = array<i64: 32, 256>}, {transform_indices = @transform_1, window_bounds = array<i64: 32, 32>}, {pipeline_mode = #tpu.pipeline_mode<synchronous>, transform_indices = @transform_2, window_bounds = array<i64: 256, 64>}, {pipeline_mode = #tpu.pipeline_mode<synchronous>, transform_indices = @transform_3, window_bounds = array<i64: 1, 64>}, {pipeline_mode = #tpu.pipeline_mode<synchronous>, transform_indices = @transform_4, window_bounds = array<i64: 64, 64>}, {pipeline_mode = #tpu.pipeline_mode<synchronous>, transform_indices = @transform_5, window_bounds = array<i64: 1, 64>}, {pipeline_mode = #tpu.pipeline_mode<synchronous>, transform_indices = @transform_6, window_bounds = array<i64: 64, 64>}, {pipeline_mode = #tpu.pipeline_mode<synchronous>, transform_indices = @transform_7, window_bounds = array<i64: 1, 64>}, {pipeline_mode = #tpu.pipeline_mode<synchronous>, transform_indices = @transform_8, window_bounds = array<i64: 32, 256>}, {pipeline_mode = #tpu.pipeline_mode<synchronous>, transform_indices = @transform_9, window_bounds = array<i64: 1, 256>}, {transform_indices = @transform_10, window_bounds = array<i64: 32, 128>}]} {
    %c0 = arith.constant 0 : index
    %c0_0 = arith.constant 0 : index
    %0 = vector.load %arg1[%c0, %c0_0] : memref<32x256xbf16, #tpu.memory_space<vmem>>, vector<32x256xbf16>
    %1 = arith.extf %0 : vector<32x256xbf16> to vector<32x256xf32>
    %c0_1 = arith.constant 0 : index
    %c0_2 = arith.constant 0 : index
    %2 = vector.load %arg3[%c0_1, %c0_2] : memref<256x64xbf16, #tpu.memory_space<vmem>>, vector<256x64xbf16>
    %cst = arith.constant dense<0.000000e+00> : vector<32x64xf32>
    %3 = tpu.matmul %0, %2, %cst {dimension_numbers = #tpu.dot_dimension_numbers<[1], [0], [0], [1], [0, 0, 1, 1], [], []>} : vector<32x256xbf16>, vector<256x64xbf16>, vector<32x64xf32> -> vector<32x64xf32>
    %c0_3 = arith.constant 0 : index
    %c0_4 = arith.constant 0 : index
    %4 = vector.load %arg4[%c0_3, %c0_4] : memref<1x64xf32, #tpu.memory_space<vmem>>, vector<1x64xf32>
    %5 = vector.broadcast %4 : vector<1x64xf32> to vector<32x64xf32>
    %6 = arith.addf %3, %5 : vector<32x64xf32>
    %7 = math.tanh %6 : vector<32x64xf32>
    %c0_5 = arith.constant 0 : index
    %c0_6 = arith.constant 0 : index
    %8 = vector.load %arg5[%c0_5, %c0_6] : memref<64x64xf32, #tpu.memory_space<vmem>>, vector<64x64xf32>
    %cst_7 = arith.constant dense<0.000000e+00> : vector<32x64xf32>
    %9 = tpu.matmul %7, %8, %cst_7 {dimension_numbers = #tpu.dot_dimension_numbers<[1], [0], [0], [1], [0, 0, 1, 1], [], []>} : vector<32x64xf32>, vector<64x64xf32>, vector<32x64xf32> -> vector<32x64xf32>
    %c0_8 = arith.constant 0 : index
    %c0_9 = arith.constant 0 : index
    %10 = vector.load %arg6[%c0_8, %c0_9] : memref<1x64xf32, #tpu.memory_space<vmem>>, vector<1x64xf32>
    %11 = vector.broadcast %10 : vector<1x64xf32> to vector<32x64xf32>
    %12 = arith.addf %9, %11 : vector<32x64xf32>
    %cst_10 = arith.constant 0.000000e+00 : f32
    %13 = vector.broadcast %cst_10 : f32 to vector<32x64xf32>
    %14 = arith.maximumf %12, %13 : vector<32x64xf32>
    %15 = math.absf %12 : vector<32x64xf32>
    %cst_11 = arith.constant 0.000000e+00 : f32
    %16 = vector.broadcast %cst_11 : f32 to vector<32x64xf32>
    %17 = arith.subf %16, %15 : vector<32x64xf32>
    %18 = math.exp %17 : vector<32x64xf32>
    %19 = math.log1p %18 : vector<32x64xf32>
    %20 = arith.addf %14, %19 : vector<32x64xf32>
    %c0_12 = arith.constant 0 : index
    %c0_13 = arith.constant 0 : index
    %21 = vector.load %arg7[%c0_12, %c0_13] : memref<64x64xf32, #tpu.memory_space<vmem>>, vector<64x64xf32>
    %cst_14 = arith.constant dense<0.000000e+00> : vector<32x64xf32>
    %22 = tpu.matmul %20, %21, %cst_14 {dimension_numbers = #tpu.dot_dimension_numbers<[1], [0], [0], [1], [0, 0, 1, 1], [], []>} : vector<32x64xf32>, vector<64x64xf32>, vector<32x64xf32> -> vector<32x64xf32>
    %c0_15 = arith.constant 0 : index
    %c0_16 = arith.constant 0 : index
    %23 = vector.load %arg8[%c0_15, %c0_16] : memref<1x64xf32, #tpu.memory_space<vmem>>, vector<1x64xf32>
    %24 = vector.broadcast %23 : vector<1x64xf32> to vector<32x64xf32>
    %25 = arith.addf %22, %24 : vector<32x64xf32>
    %26 = vector.extract_strided_slice %25 {offsets = [0, 0], sizes = [32, 32], strides = [1, 1]} : vector<32x64xf32> to vector<32x32xf32>
    %27 = vector.extract_strided_slice %25 {offsets = [0, 32], sizes = [32, 32], strides = [1, 1]} : vector<32x64xf32> to vector<32x32xf32>
    %cst_17 = arith.constant 5.000000e-01 : f32
    %28 = vector.broadcast %cst_17 : f32 to vector<32x32xf32>
    %29 = arith.mulf %28, %27 : vector<32x32xf32>
    %30 = math.exp %29 : vector<32x32xf32>
    %c0_18 = arith.constant 0 : index
    %c0_19 = arith.constant 0 : index
    %31 = vector.load %arg2[%c0_18, %c0_19] : memref<32x32xf32, #tpu.memory_space<vmem>>, vector<32x32xf32>
    %32 = arith.mulf %30, %31 : vector<32x32xf32>
    %33 = arith.addf %26, %32 : vector<32x32xf32>
    %cst_20 = arith.constant dense<0xFF800000> : vector<32xf32>
    %34 = vector.multi_reduction <maximumf>, %33, %cst_20 [1] : vector<32x32xf32> to vector<32xf32>
    %35 = vector.shape_cast %34 : vector<32xf32> to vector<32x1xf32>
    %36 = vector.broadcast %35 : vector<32x1xf32> to vector<32x32xf32>
    %37 = arith.subf %33, %36 : vector<32x32xf32>
    %38 = math.exp %37 : vector<32x32xf32>
    %cst_21 = arith.constant dense<0.000000e+00> : vector<32xf32>
    %39 = vector.multi_reduction <add>, %38, %cst_21 [1] : vector<32x32xf32> to vector<32xf32>
    %40 = vector.shape_cast %39 : vector<32xf32> to vector<32x1xf32>
    %41 = tpu.reciprocal %40 {approx = true} : vector<32x1xf32> -> vector<32x1xf32>
    %42 = vector.broadcast %41 : vector<32x1xf32> to vector<32x32xf32>
    %43 = arith.mulf %38, %42 : vector<32x32xf32>
    %44 = arith.mulf %30, %30 : vector<32x32xf32>
    %45 = arith.mulf %26, %26 : vector<32x32xf32>
    %46 = arith.addf %44, %45 : vector<32x32xf32>
    %cst_22 = arith.constant 1.06555676 : f32
    %47 = vector.broadcast %cst_22 : f32 to vector<32x32xf32>
    %48 = arith.mulf %46, %47 : vector<32x32xf32>
    %49 = arith.subf %48, %27 : vector<32x32xf32>
    %cst_23 = arith.constant dense<0.000000e+00> : vector<32xf32>
    %50 = vector.multi_reduction <add>, %49, %cst_23 [1] : vector<32x32xf32> to vector<32xf32>
    %51 = vector.shape_cast %50 : vector<32xf32> to vector<32x1xf32>
    %cst_24 = arith.constant -2.03191662 : f32
    %52 = vector.broadcast %cst_24 : f32 to vector<32x1xf32>
    %53 = arith.addf %51, %52 : vector<32x1xf32>
    %cst_25 = arith.constant 3.200000e+01 : f32
    %54 = vector.broadcast %cst_25 : f32 to vector<32x1xf32>
    %55 = arith.subf %53, %54 : vector<32x1xf32>
    %cst_26 = arith.constant 5.000000e-01 : f32
    %56 = vector.broadcast %cst_26 : f32 to vector<32x1xf32>
    %57 = arith.mulf %56, %55 : vector<32x1xf32>
    %cst_27 = arith.constant 1.000000e+00 : f32
    %58 = vector.broadcast %cst_27 : f32 to vector<32x1xf32>
    %59 = arith.mulf %57, %58 : vector<32x1xf32>
    %60 = arith.truncf %43 : vector<32x32xf32> to vector<32x32xbf16>
    %c0_28 = arith.constant 0 : index
    %c0_29 = arith.constant 0 : index
    %61 = vector.load %arg9[%c0_28, %c0_29] : memref<32x256xbf16, #tpu.memory_space<vmem>>, vector<32x256xbf16>
    %cst_30 = arith.constant dense<0.000000e+00> : vector<32x256xf32>
    %62 = tpu.matmul %60, %61, %cst_30 {dimension_numbers = #tpu.dot_dimension_numbers<[1], [0], [0], [1], [0, 0, 1, 1], [], []>} : vector<32x32xbf16>, vector<32x256xbf16>, vector<32x256xf32> -> vector<32x256xf32>
    %c0_31 = arith.constant 0 : index
    %c0_32 = arith.constant 0 : index
    %63 = vector.load %arg10[%c0_31, %c0_32] : memref<1x256xf32, #tpu.memory_space<vmem>>, vector<1x256xf32>
    %64 = vector.broadcast %63 : vector<1x256xf32> to vector<32x256xf32>
    %65 = arith.addf %62, %64 : vector<32x256xf32>
    %cst_33 = arith.constant dense<0xFF800000> : vector<32xf32>
    %66 = vector.multi_reduction <maximumf>, %65, %cst_33 [1] : vector<32x256xf32> to vector<32xf32>
    %67 = vector.shape_cast %66 : vector<32xf32> to vector<32x1xf32>
    %68 = vector.broadcast %67 : vector<32x1xf32> to vector<32x256xf32>
    %69 = arith.subf %65, %68 : vector<32x256xf32>
    %70 = math.exp %69 : vector<32x256xf32>
    %cst_34 = arith.constant dense<0.000000e+00> : vector<32xf32>
    %71 = vector.multi_reduction <add>, %70, %cst_34 [1] : vector<32x256xf32> to vector<32xf32>
    %72 = vector.shape_cast %71 : vector<32xf32> to vector<32x1xf32>
    %73 = math.log %72 : vector<32x1xf32>
    %74 = arith.addf %67, %73 : vector<32x1xf32>
    %75 = vector.broadcast %74 : vector<32x1xf32> to vector<32x256xf32>
    %76 = arith.subf %75, %65 : vector<32x256xf32>
    %77 = arith.mulf %1, %76 : vector<32x256xf32>
    %cst_35 = arith.constant dense<0.000000e+00> : vector<32xf32>
    %78 = vector.multi_reduction <add>, %77, %cst_35 [1] : vector<32x256xf32> to vector<32xf32>
    %79 = vector.shape_cast %78 : vector<32xf32> to vector<32x1xf32>
    %80 = arith.addf %79, %59 : vector<32x1xf32>
    %81 = tpu.iota {dimensions = array<i32: 1>} : vector<32x128xi32>
    %cst_36 = arith.constant 0.000000e+00 : f32
    %82 = vector.broadcast %cst_36 : f32 to vector<32x96xf32>
    %83 = tpu.concatenate %26, %82 in 1 : vector<32x32xf32>, vector<32x96xf32> -> vector<32x128xf32>
    %c32_i32 = arith.constant 32 : i32
    %84 = vector.broadcast %c32_i32 : i32 to vector<32x128xi32>
    %85 = arith.cmpi eq, %81, %84 : vector<32x128xi32>
    %86 = vector.shape_cast %80 : vector<32x1xf32> to vector<32x1xf32>
    %87 = vector.broadcast %86 : vector<32x1xf32> to vector<32x128xf32>
    %88 = arith.select %85, %87, %83 : vector<32x128xi1>, vector<32x128xf32>
    %c33_i32 = arith.constant 33 : i32
    %89 = vector.broadcast %c33_i32 : i32 to vector<32x128xi32>
    %90 = arith.cmpi eq, %81, %89 : vector<32x128xi32>
    %91 = vector.shape_cast %79 : vector<32x1xf32> to vector<32x1xf32>
    %92 = vector.broadcast %91 : vector<32x1xf32> to vector<32x128xf32>
    %93 = arith.select %90, %92, %88 : vector<32x128xi1>, vector<32x128xf32>
    %c34_i32 = arith.constant 34 : i32
    %94 = vector.broadcast %c34_i32 : i32 to vector<32x128xi32>
    %95 = arith.cmpi eq, %81, %94 : vector<32x128xi32>
    %96 = vector.shape_cast %59 : vector<32x1xf32> to vector<32x1xf32>
    %97 = vector.broadcast %96 : vector<32x1xf32> to vector<32x128xf32>
    %98 = arith.select %95, %97, %93 : vector<32x128xi1>, vector<32x128xf32>
    %c0_37 = arith.constant 0 : index
    %c0_38 = arith.constant 0 : index
    %99 = vector.load %arg11[%c0_37, %c0_38] : memref<32x128xf32, #tpu.memory_space<vmem>>, vector<32x128xf32>
    tpu.vector_store %arg11[%c0_37, %c0_38], %98 {strides = array<i32>} : memref<32x128xf32, #tpu.memory_space<vmem>>, vector<32x128xf32>,
    return
  }
  func.func @transform_0(%arg0: i32) -> (i32, i32) {
    %c0_i32 = arith.constant 0 : i32
    %c0_i32_0 = arith.constant 0 : i32
    return %arg0, %c0_i32 : i32, i32
  }
  func.func @transform_1(%arg0: i32) -> (i32, i32) {
    %c0_i32 = arith.constant 0 : i32
    %c0_i32_0 = arith.constant 0 : i32
    return %arg0, %c0_i32 : i32, i32
  }
  func.func @transform_2(%arg0: i32) -> (i32, i32) {
    %c0_i32 = arith.constant 0 : i32
    %c0_i32_0 = arith.constant 0 : i32
    %c0_i32_1 = arith.constant 0 : i32
    return %c0_i32, %c0_i32_0 : i32, i32
  }
  func.func @transform_3(%arg0: i32) -> (i32, i32) {
    %c0_i32 = arith.constant 0 : i32
    %c0_i32_0 = arith.constant 0 : i32
    %c0_i32_1 = arith.constant 0 : i32
    return %c0_i32, %c0_i32_0 : i32, i32
  }
  func.func @transform_4(%arg0: i32) -> (i32, i32) {
    %c0_i32 = arith.constant 0 : i32
    %c0_i32_0 = arith.constant 0 : i32
    %c0_i32_1 = arith.constant 0 : i32
    return %c0_i32, %c0_i32_0 : i32, i32
  }
  func.func @transform_5(%arg0: i32) -> (i32, i32) {
    %c0_i32 = arith.constant 0 : i32
    %c0_i32_0 = arith.constant 0 : i32
    %c0_i32_1 = arith.constant 0 : i32
    return %c0_i32, %c0_i32_0 : i32, i32
  }
  func.func @transform_6(%arg0: i32) -> (i32, i32) {
    %c0_i32 = arith.constant 0 : i32
    %c0_i32_0 = arith.constant 0 : i32
    %c0_i32_1 = arith.constant 0 : i32
    return %c0_i32, %c0_i32_0 : i32, i32
  }
  func.func @transform_7(%arg0: i32) -> (i32, i32) {
    %c0_i32 = arith.constant 0 : i32
    %c0_i32_0 = arith.constant 0 : i32
    %c0_i32_1 = arith.constant 0 : i32
    return %c0_i32, %c0_i32_0 : i32, i32
  }
  func.func @transform_8(%arg0: i32) -> (i32, i32) {
    %c0_i32 = arith.constant 0 : i32
    %c0_i32_0 = arith.constant 0 : i32
    %c0_i32_1 = arith.constant 0 : i32
    return %c0_i32, %c0_i32_0 : i32, i32
  }
  func.func @transform_9(%arg0: i32) -> (i32, i32) {
    %c0_i32 = arith.constant 0 : i32
    %c0_i32_0 = arith.constant 0 : i32
    %c0_i32_1 = arith.constant 0 : i32
    return %c0_i32, %c0_i32_0 : i32, i32
  }
  func.func @transform_10(%arg0: i32) -> (i32, i32) {
    %c0_i32 = arith.constant 0 : i32
    %c0_i32_0 = arith.constant 0 : i32
    return %arg0, %c0_i32 : i32, i32
  }
}

</mosaic_0001>

<bundles_post_ra>
// kernel: metric_bow_vae_forward.1
= control target key start
LH: loop header
LB: loop body
LE: loop exit
PB: predicated region body
PF: predicated region fallthrough
CT: control target
= control target key end

     0   :  { %vm254_vm0 = vcmask 523264   ;;  %s1013_s18 = smov 96   ;;  %vm465_vm5 = vcmask 261120   ;;  %s1424_s2 = inlined_call_operand.vmem [shape: bf16[256,64], index: 2, kind: input, shape index: {}]   ;;  %s1425_s3 = inlined_call_operand.vmem [shape: f32[1,64], index: 3, kind: input, shape index: {}]   ;;  %s1426_s4 = inlined_call_operand.vmem [shape: f32[64,64], index: 4, kind: input, shape index: {}]   ;;  %s1427_s0 = inlined_call_operand.vmem [shape: bf16[32,256], index: 0, kind: input, shape index: {}]   ;;  %s1428_s5 = inlined_call_operand.vmem [shape: f32[1,64], index: 5, kind: input, shape index: {}]   ;;  %s1429_s7 = inlined_call_operand.vmem [shape: f32[1,64], index: 7, kind: input, shape index: {}]   ;;  %s1430_s6 = inlined_call_operand.vmem [shape: f32[64,64], index: 6, kind: input, shape index: {}]   ;;  %s1431_s1 = inlined_call_operand.vmem [shape: f32[32,32], index: 1, kind: input, shape index: {}]   ;;  %s1432_s8 = inlined_call_operand.vmem [shape: bf16[32,256], index: 8, kind: input, shape index: {}]   ;;  %s1433_s9 = inlined_call_operand.vmem [shape: f32[1,256], index: 9, kind: input, shape index: {}]   ;;  %s1434_s10 = inlined_call_operand.vmem [shape: f32[32,128], index: 10, kind: output, shape index: {}]  }
   0x1   :  { %v906_v0 = vld [vmem:[%s1424_s2 + $0x38] sm:$0xff]  ;;  %v905_v2 = vld [vmem:[%s1424_s2 + $0x30] sm:$0xff]  ;;  %v904_v4 = vld [vmem:[%s1424_s2 + $0x28] sm:$0xff] }
   0x2   :  { %v914_v1 = vld [vmem:[%s1424_s2 + $0x78] sm:$0xff]  ;;  %200 = vmatpush.bf16.msra.mxu0 %v906_v0  ;;  %v913_v3 = vld [vmem:[%s1424_s2 + $0x70] sm:$0xff]  ;;  %v912_v5 = vld [vmem:[%s1424_s2 + $0x68] sm:$0xff] }
   0x3   :  { %219 = vmatpush.bf16.msra.mxu1 %v914_v1  ;;  %v903_v6 = vld [vmem:[%s1424_s2 + $0x20] sm:$0xff]  ;;  %v902_v8 = vld [vmem:[%s1424_s2 + $0x18] sm:$0xff]  ;;  %v901_v10 = vld [vmem:[%s1424_s2 + $0x10] sm:$0xff] }
   0x4   :  { %v911_v7 = vld [vmem:[%s1424_s2 + $0x60] sm:$0xff]  ;;  %v910_v9 = vld [vmem:[%s1424_s2 + $0x58] sm:$0xff]  ;;  %v909_v11 = vld [vmem:[%s1424_s2 + $0x50] sm:$0xff] }
   0x5   :  { %v249_v12 = vld [vmem:[%s1426_s4 + $0x38] sm:$0xff]  ;;  %v248_v13 = vld [vmem:[%s1426_s4 + $0x30] sm:$0xff]  ;;  %v900_v14 = vld [vmem:[%s1424_s2 + $0x8] sm:$0xff] }
   0x6   :  { %201 = vmatpush.bf16.msra.mxu0 %v905_v2  ;;  %919 = vmatpush.msra.mxu2 %v249_v12  ;;  %v908_v15 = vld [vmem:[%s1424_s2 + $0x48] sm:$0xff]  ;;  %v899_v16 = vld [vmem:[%s1424_s2] sm:$0xff]  ;;  %v793_v24 = vld [vmem:[%s1427_s0 + $0x10] sm:$0xf] }
   0x7   :  { %220 = vmatpush.bf16.msra.mxu1 %v913_v3  ;;  %v907_v17 = vld [vmem:[%s1424_s2 + $0x40] sm:$0xff]  ;;  %v896_v19 = vld [vmem:[%s1427_s0 + $0x4] sm:$0xf0]  ;;  %v787_v21 = vld [vmem:[%s1427_s0 + $0x8] sm:$0xf0] }
   0x8   :  { %920 = vmatpush.msra.mxu2 %v248_v13  ;;  %v785_v18 = vld [vmem:[%s1427_s0] sm:$0xf]  ;;  %v895_v20 = vld [vmem:[%s1427_s0 + $0x4] sm:$0xf]  ;;  %v898_v25 = vld [vmem:[%s1427_s0 + $0x14] sm:$0xf0] }
   0x9   :  { %v786_v22 = vor.u32 %v896_v19, %v785_v18  ;;  %v790_v23 = vor.u32 %v895_v20, %v787_v21  ;;  %v897_v26 = vld [vmem:[%s1427_s0 + $0x14] sm:$0xf]  ;;  %v795_v27 = vld [vmem:[%s1427_s0 + $0x18] sm:$0xf0]  ;;  %v794_v28 = vor.u32 %v898_v25, %v793_v24  ;;  %v247_v30 = vld [vmem:[%s1426_s4 + $0x28] sm:$0xff] }
   0xa   :  { %202 = vmatpush.bf16.msra.mxu0 %v904_v4  ;;  %v798_v29 = vor.u32 %v897_v26, %v795_v27  ;;  %921 = vmatpush.msra.mxu2 %v247_v30  ;;  %v246_v31 = vld [vmem:[%s1426_s4 + $0x20] sm:$0xff]  ;;  %v245_v32 = vld [vmem:[%s1426_s4 + $0x18] sm:$0xff]  ;;  %v244_v33 = vld [vmem:[%s1426_s4 + $0x10] sm:$0xff] }
   0xb   :  { %221 = vmatpush.bf16.msra.mxu1 %v912_v5  ;;  %v243_v34 = vld [vmem:[%s1426_s4 + $0x8] sm:$0xff]  ;;  %v242_v35 = vld [vmem:[%s1426_s4] sm:$0xff]  ;;  %v363_v57 = vld [vmem:[%s1430_s6 + $0x38] sm:$0xff] }
   0xc   :  { %922 = vmatpush.msra.mxu2 %v246_v31  ;;  %v937_v36 = vld [vmem:[%s1425_s3] ss:$0 sm:$0xff]  ;;  %927 = vmatpush.msra.mxu3 %v363_v57  ;;  %v362_v58 = vld [vmem:[%s1430_s6 + $0x30] sm:$0xff]  ;;  %v361_v59 = vld [vmem:[%s1430_s6 + $0x28] sm:$0xff] }
   0xd   :  { %v360_v60 = vld [vmem:[%s1430_s6 + $0x20] sm:$0xff]  ;;  %v359_v61 = vld [vmem:[%s1430_s6 + $0x18] sm:$0xff]  ;;  %v358_v62 = vld [vmem:[%s1430_s6 + $0x10] sm:$0xff] }
   0xe   :  { %203 = vmatpush.bf16.msra.mxu0 %v903_v6  ;;  %923 = vmatpush.msra.mxu2 %v245_v32  ;;  %v357_v63 = vld [vmem:[%s1430_s6 + $0x8] sm:$0xff]  ;;  %v356_v0 = vld [vmem:[%s1430_s6] sm:$0xff] }
   0xf   :  { %222 = vmatpush.bf16.msra.mxu1 %v911_v7  ;;  %928 = vmatpush.msra.mxu3 %v362_v58  ;;  %v938_v1 = vld [vmem:[%s1428_s5] ss:$0 sm:$0xff]  ;;  %s1012_s5 = smov 32  }
  0x10   :  { %924 = vmatpush.msra.mxu2 %v244_v33 }
  0x11   :  { %929 = vmatpush.msra.mxu3 %v361_v59 }
  0x12   :  { %204 = vmatpush.bf16.msra.mxu0 %v902_v8  ;;  %925 = vmatpush.msra.mxu2 %v243_v34 }
  0x13   :  { %223 = vmatpush.bf16.msra.mxu1 %v910_v9  ;;  %930 = vmatpush.msra.mxu3 %v360_v60 }
  0x14   :  { %926 = vmatpush.msra.mxu2 %v242_v35 }
  0x15   :  { %931 = vmatpush.msra.mxu3 %v359_v61 }
  0x16   :  { %205 = vmatpush.bf16.msra.mxu0 %v901_v10 }
  0x17   :  { %224 = vmatpush.bf16.msra.mxu1 %v909_v11  ;;  %932 = vmatpush.msra.mxu3 %v358_v62 }
  0x19   :  { %933 = vmatpush.msra.mxu3 %v357_v63 }
  0x1a   :  { %206 = vmatpush.bf16.msra.mxu0 %v900_v14  ;;  %v421_v14 = vld [vmem:[%s1431_s1] sm:$0xff] }
  0x1b   :  { %225 = vmatpush.bf16.msra.mxu1 %v908_v15  ;;  %934 = vmatpush.msra.mxu3 %v356_v0 }
  0x1c   :  { %429 = vrot.lane.b32.xlu0 %v421_v14, %s1012_s5 }
  0x1e   :  { %207 = vmatpush.bf16.msra.mxu0 %v899_v16 }
  0x1f   :  { %226 = vmatpush.bf16.msra.mxu1 %v907_v17 }
  0x21   :  { %208 = vmatmul.bf16.vlgmr.msra.gmra.mxu0 %v786_v22 }
  0x22   :  { %275 = vmatpush.msrb.mxu0 %v249_v12  ;;  %227 = vmatmul.bf16.vlgmr.msra.gmra.mxu1 %v790_v23 }
  0x23   :  { %388 = vmatpush.msrb.mxu1 %v363_v57 }
  0x24   :  { %276 = vmatpush.msrb.mxu0 %v248_v13 }
  0x25   :  { %389 = vmatpush.msrb.mxu1 %v362_v58 }
  0x26   :  { %277 = vmatpush.msrb.mxu0 %v247_v30 }
  0x27   :  { %390 = vmatpush.msrb.mxu1 %v361_v59 }
  0x28   :  { %278 = vmatpush.msrb.mxu0 %v246_v31 }
  0x29   :  { %391 = vmatpush.msrb.mxu1 %v360_v60 }
  0x2a   :  { %279 = vmatpush.msrb.mxu0 %v245_v32 }
  0x2b   :  { %392 = vmatpush.msrb.mxu1 %v359_v61 }
  0x2c   :  { %280 = vmatpush.msrb.mxu0 %v244_v33 }
  0x2d   :  { %393 = vmatpush.msrb.mxu1 %v358_v62 }
  0x2e   :  { %281 = vmatpush.msrb.mxu0 %v243_v34 }
  0x2f   :  { %394 = vmatpush.msrb.mxu1 %v357_v63 }
  0x30   :  { %282 = vmatpush.msrb.mxu0 %v242_v35 }
  0x31   :  { %213 = vmatmul.bf16.gmra.mxu0 %v794_v28  ;;  %395 = vmatpush.msrb.mxu1 %v356_v0  ;;  %v422_v28 = vld [vmem:[%s1431_s1 + $0x8] sm:$0xff] }
  0x32   :  { %232 = vmatmul.bf16.gmra.mxu1 %v798_v29  ;;  %v423_v29 = vld [vmem:[%s1431_s1 + $0x10] sm:$0xff]  ;;  %431 = vrot.lane.b32.xlu0 %v422_v28, %s1012_s5 }
  0x33   :  { %433 = vrot.lane.b32.xlu1 %v423_v29, %s1012_s5 }
  0x9e   :  { %v209_v37 = vpop.f32.mrf.mxu0 }
  0x9f   :  { %v228_v38 = vpop.f32.mrf.mxu1  ;;  %v210_v39 = vadd.f32 %v937_v36, %v209_v37  ;;  %v424_v37 = vld [vmem:[%s1431_s1 + $0x18] sm:$0xff] }
  0xa0   :  { %435 = vrot.lane.b32.xlu1 %v424_v37, %s1012_s5 }
  0xa1   :  { %v229_v40 = vadd.f32 %v228_v38, %v210_v39 }
  0xa3   :  { %940 = vtanh.f32 %v229_v40 }
  0xa6   :  { %v211_v41 = vpop.f32.mrf.mxu0 }
  0xa7   :  { %v230_v42 = vpop.f32.mrf.mxu1  ;;  %v212_v43 = vadd.f32 %v937_v36, %v211_v41 }
  0xa9   :  { %v941_v44 = vpop.eup %940  ;;  %v231_v45 = vadd.f32 %v230_v42, %v212_v43 }
  0xaa   :  { %863 = vmatmul.msk.f32.vlgmr.msrb.gmra.mxu0 %vm254_vm0, %v941_v44 }
  0xab   :  { %942 = vtanh.f32 %v231_v45 }
  0xae   :  { %v214_v46 = vpop.f32.mrf.mxu0 }
  0xaf   :  { %v233_v47 = vpop.f32.mrf.mxu1  ;;  %v215_v48 = vadd.f32 %v937_v36, %v214_v46 }
  0xb1   :  { %v943_v49 = vpop.eup %942  ;;  %v234_v50 = vadd.f32 %v233_v47, %v215_v48 }
  0xb2   :  { %864 = vmatmul.msk.f32.vlgmr.msra.gmra.mxu2 %vm254_vm0, %v943_v49 }
  0xb3   :  { %944 = vtanh.f32 %v234_v50 }
  0xb6   :  { %v216_v51 = vpop.f32.mrf.mxu0 }
  0xb7   :  { %v217_v52 = vadd.f32 %v937_v36, %v216_v51  ;;  %v235_v53 = vpop.f32.mrf.mxu1 }
  0xb9   :  { %v945_v54 = vpop.eup %944  ;;  %v236_v55 = vadd.f32 %v235_v53, %v217_v52 }
  0xba   :  { %865 = vmatmul.msk.f32.gmra.mxu2 %vm254_vm0, %v945_v54 }
  0xbb   :  { %946 = vtanh.f32 %v236_v55 }
  0xc1   :  { %v947_v56 = vpop.eup %946 }
  0xc2   :  { %866 = vmatmul.msk.f32.gmra.mxu2 %vm254_vm0, %v947_v56 }
 0x127   :  { %v284_v2 = vpop.f32.mrf.mxu0 }
 0x128   :  { %v285_v3 = vadd.f32 %v938_v1, %v284_v2 }
 0x12a   :  { %v300_v4 = vand.u32 2147483647, %v285_v3  ;;  %v296_v24 = vmax.f32 %v285_v3, 0.0 }
 0x12c   :  { %v304_v5 = vsub.f32 0.0, %v300_v4 }
 0x12e   :  { %v308_v6 = vmul.f32 1.442695, %v304_v5 }
 0x130   :  { %948 = vpow2.f32 %v308_v6  ;;  %v939_v6 = vld [vmem:[%s1429_s7] ss:$0 sm:$0xff] }
 0x135   :  { %v287_v7 = vpop.f32.mrf.mxu2 }
 0x136   :  { %v949_v8 = vpop.eup %948  ;;  %v288_v9 = vadd.f32 %v938_v1, %v287_v7 }
 0x137   :  { %v316_v10 = vadd.f32 1.0, %v949_v8  ;;  %v319_v11 = vmul.f32 -0.5, %v949_v8  ;;  %v322_v17 = vand.u32 2147483647, %v949_v8 }
 0x138   :  { %v301_v12 = vand.u32 2147483647, %v288_v9  ;;  %v297_v48 = vmax.f32 %v288_v9, 0.0 }
 0x139   :  { %950 = vlog2.f32 %v316_v10  ;;  %v320_v15 = vadd.f32 1.0, %v319_v11  ;;  %vm323_vm1 = vcmp.lt.f32.partialorder %v322_v17, 0.0004427343  ;;  %v430_v11 = vpop.permute.xlu0 %429 }
 0x13a   :  { %v305_v13 = vsub.f32 0.0, %v301_v12 }
 0x13b   :  { %v321_v22 = vmul.f32 %v949_v8, %v320_v15 }
 0x13c   :  { %v310_v16 = vmul.f32 1.442695, %v305_v13 }
 0x13d   :  { %v290_v18 = vpop.f32.mrf.mxu2 }
 0x13e   :  { %952 = vpow2.f32 %v310_v16  ;;  %v291_v19 = vadd.f32 %v938_v1, %v290_v18 }
 0x13f   :  { %v951_v20 = vpop.eup %950 }
 0x140   :  { %v318_v21 = vmul.f32 0.6931472, %v951_v20  ;;  %v302_v23 = vand.u32 2147483647, %v291_v19  ;;  %v298_v59 = vmax.f32 %v291_v19, 0.0 }
 0x141   :  { %v432_v20 = vpop.permute.xlu0 %431 }
 0x142   :  { %v324_v25 = vsel %vm323_vm1, %v321_v22, %v318_v21  ;;  %v306_v26 = vsub.f32 0.0, %v302_v23 }
 0x143   :  { %v352_v27 = vadd.f32 %v324_v25, %v296_v24 }
 0x144   :  { %v953_v30 = vpop.eup %952  ;;  %v312_v31 = vmul.f32 1.442695, %v306_v26 }
 0x145   :  { %v293_v32 = vpop.f32.mrf.mxu2  ;;  %867 = vmatmul.msk.f32.vlgmr.msrb.gmra.mxu1 %vm254_vm0, %v352_v27  ;;  %v325_v33 = vadd.f32 1.0, %v953_v30  ;;  %v328_v35 = vmul.f32 -0.5, %v953_v30  ;;  %v331_v40 = vand.u32 2147483647, %v953_v30  ;;  %v434_v27 = vpop.permute.xlu1 %433 }
 0x146   :  { %954 = vpow2.f32 %v312_v31  ;;  %v294_v34 = vadd.f32 %v938_v1, %v293_v32 }
 0x147   :  { %956 = vlog2.f32 %v325_v33  ;;  %v329_v39 = vadd.f32 1.0, %v328_v35  ;;  %vm332_vm2 = vcmp.lt.f32.partialorder %v331_v40, 0.0004427343 }
 0x148   :  { %v303_v36 = vand.u32 2147483647, %v294_v34  ;;  %v299_v3 = vmax.f32 %v294_v34, 0.0 }
 0x149   :  { %v330_v46 = vmul.f32 %v953_v30, %v329_v39 }
 0x14a   :  { %v307_v38 = vsub.f32 0.0, %v303_v36 }
 0x14c   :  { %v955_v41 = vpop.eup %954  ;;  %v314_v42 = vmul.f32 1.442695, %v307_v38 }
 0x14d   :  { %v957_v43 = vpop.eup %956  ;;  %v334_v44 = vadd.f32 1.0, %v955_v41  ;;  %v337_v47 = vmul.f32 -0.5, %v955_v41  ;;  %v340_v52 = vand.u32 2147483647, %v955_v41  ;;  %v436_v32 = vpop.permute.xlu1 %435 }
 0x14e   :  { %958 = vpow2.f32 %v314_v42  ;;  %v327_v45 = vmul.f32 0.6931472, %v957_v43 }
 0x14f   :  { %960 = vlog2.f32 %v334_v44  ;;  %v338_v51 = vadd.f32 1.0, %v337_v47  ;;  %vm341_vm3 = vcmp.lt.f32.partialorder %v340_v52, 0.0004427343 }
 0x150   :  { %v333_v49 = vsel %vm332_vm2, %v330_v46, %v327_v45 }
 0x151   :  { %v353_v50 = vadd.f32 %v333_v49, %v297_v48  ;;  %v339_v57 = vmul.f32 %v955_v41, %v338_v51 }
 0x153   :  { %868 = vmatmul.msk.f32.vlgmr.msra.gmra.mxu3 %vm254_vm0, %v353_v50 }
 0x154   :  { %v959_v53 = vpop.eup %958 }
 0x155   :  { %v961_v54 = vpop.eup %960  ;;  %v343_v55 = vadd.f32 1.0, %v959_v53  ;;  %v346_v58 = vmul.f32 -0.5, %v959_v53  ;;  %v349_v63 = vand.u32 2147483647, %v959_v53 }
 0x156   :  { %v336_v56 = vmul.f32 0.6931472, %v961_v54 }
 0x157   :  { %962 = vlog2.f32 %v343_v55  ;;  %v347_v62 = vadd.f32 1.0, %v346_v58  ;;  %vm350_vm4 = vcmp.lt.f32.partialorder %v349_v63, 0.0004427343 }
 0x158   :  { %v342_v60 = vsel %vm341_vm3, %v339_v57, %v336_v56 }
 0x159   :  { %v354_v61 = vadd.f32 %v342_v60, %v298_v59  ;;  %v348_v2 = vmul.f32 %v959_v53, %v347_v62 }
 0x15b   :  { %869 = vmatmul.msk.f32.gmra.mxu3 %vm254_vm0, %v354_v61 }
 0x15d   :  { %v963_v0 = vpop.eup %962 }
 0x15e   :  { %v345_v1 = vmul.f32 0.6931472, %v963_v0 }
 0x160   :  { %v351_v4 = vsel %vm350_vm4, %v348_v2, %v345_v1 }
 0x161   :  { %v355_v5 = vadd.f32 %v351_v4, %v299_v3 }
 0x163   :  { %870 = vmatmul.msk.f32.gmra.mxu3 %vm254_vm0, %v355_v5  ;;  %v885_v5 = vld [vmem:[%s1432_s8 + $0x10] sm:$0xf] }
 0x1c2   :  { %v397_v7 = vpop.f32.mrf.mxu1 }
 0x1c3   :  { %v1222_v8 = vadd.f32 %v939_v6, %v397_v7  ;;  %v917_v7 = vld [vmem:[%s1432_s8 + $0x14] sm:$0xf] }
 0x1c5   :  { %v409_v9 = vmul.f32 0.5, %v1222_v8  ;;  %v514_v3 = vmul.f32 %v1222_v8, %v1222_v8 }
 0x1c7   :  { %v413_v10 = vmul.f32 1.442695, %v409_v9 }
 0x1c9   :  { %964 = vpow2.f32 %v413_v10  ;;  %v887_v10 = vld [vmem:[%s1432_s8 + $0x18] sm:$0xf0] }
 0x1cf   :  { %v1225_v12 = vpop.eup %964 }
 0x1d0   :  { %v441_v13 = vmul.f32 %v1225_v12, %v430_v11  ;;  %v890_v11 = vor.u32 %v917_v7, %v887_v10 }
 0x1d2   :  { %449 = vrot.lane.b32.xlu2 %v441_v13, %s1013_s18  ;;  %649 = vmatpush.bf16.msrb.mxu3 %v890_v11  ;;  %v877_v13 = vld [vmem:[%s1432_s8] sm:$0xf] }
 0x1d6   :  { %v400_v14 = vpop.f32.mrf.mxu3 }
 0x1d7   :  { %v1229_v15 = vadd.f32 %v939_v6, %v400_v14  ;;  %v916_v14 = vld [vmem:[%s1432_s8 + $0x4] sm:$0xf0] }
 0x1d9   :  { %v410_v16 = vmul.f32 0.5, %v1229_v15  ;;  %v515_v4 = vmul.f32 %v1229_v15, %v1229_v15 }
 0x1db   :  { %v415_v17 = vmul.f32 1.442695, %v410_v16  ;;  %v915_v16 = vld [vmem:[%s1432_s8 + $0x4] sm:$0xf] }
 0x1dd   :  { %966 = vpow2.f32 %v415_v17  ;;  %v878_v17 = vor.u32 %v916_v14, %v877_v13 }
 0x1de   :  { %v403_v18 = vpop.f32.mrf.mxu3 }
 0x1df   :  { %v1232_v19 = vadd.f32 %v939_v6, %v403_v18  ;;  %v879_v18 = vld [vmem:[%s1432_s8 + $0x8] sm:$0xf0] }
 0x1e1   :  { %v411_v21 = vmul.f32 0.5, %v1232_v19 }
 0x1e3   :  { %v1235_v22 = vpop.eup %966  ;;  %v417_v23 = vmul.f32 1.442695, %v411_v21 }
 0x1e4   :  { %v442_v24 = vmul.f32 %v1235_v22, %v432_v20  ;;  %v882_v20 = vor.u32 %v915_v16, %v879_v18 }
 0x1e5   :  { %968 = vpow2.f32 %v417_v23 }
 0x1e6   :  { %v406_v25 = vpop.f32.mrf.mxu3  ;;  %451 = vrot.lane.b32.xlu2 %v442_v24, %s1013_s18  ;;  %650 = vmatpush.bf16.msrb.mxu3 %v882_v20 }
 0x1e7   :  { %v1239_v26 = vadd.f32 %v939_v6, %v406_v25  ;;  %v918_v6 = vld [vmem:[%s1432_s8 + $0x14] sm:$0xf0] }
 0x1e8   :  { %v886_v9 = vor.u32 %v918_v6, %v885_v5 }
 0x1e9   :  { %v412_v28 = vmul.f32 0.5, %v1239_v26 }
 0x1ea   :  { %630 = vmatpush.bf16.msrb.mxu2 %v886_v9 }
 0x1eb   :  { %v1242_v29 = vpop.eup %968  ;;  %v419_v30 = vmul.f32 1.442695, %v412_v28 }
 0x1ec   :  { %v443_v31 = vmul.f32 %v1242_v29, %v434_v27 }
 0x1ed   :  { %970 = vpow2.f32 %v419_v30 }
 0x1ee   :  { %453 = vrot.lane.b32.xlu0 %v443_v31, %s1013_s18  ;;  %631 = vmatpush.bf16.msrb.mxu2 %v878_v17 }
 0x1f3   :  { %v1246_v33 = vpop.eup %970 }
 0x1f4   :  { %v444_v34 = vmul.f32 %v1246_v33, %v436_v32 }
 0x1f6   :  { %455 = vrot.lane.b32.xlu1 %v444_v34, %s1013_s18 }
 0x22c   :  { %v450_v35 = vpop.permute.xlu2 %449 }
 0x22d   :  { %v461_v36 = vadd.f32 %v450_v35, %v1222_v8 }
 0x22f   :  { %v466_v37 = vsel %vm465_vm5, %v461_v36, -inf }
 0x230   :  { %467 = vmax.xlane.f32.xlu2 %v466_v37 }
 0x240   :  { %v452_v38 = vpop.permute.xlu2 %451 }
 0x241   :  { %v462_v39 = vadd.f32 %v452_v38, %v1229_v15 }
 0x243   :  { %v469_v40 = vsel %vm465_vm5, %v462_v39, -inf }
 0x244   :  { %470 = vmax.xlane.f32.xlu0 %v469_v40 }
 0x260   :  { %v454_v41 = vpop.permute.xlu0 %453 }
 0x261   :  { %v463_v42 = vadd.f32 %v454_v41, %v1232_v19 }
 0x263   :  { %v472_v43 = vsel %vm465_vm5, %v463_v42, -inf }
 0x264   :  { %473 = vmax.xlane.f32.xlu1 %v472_v43 }
 0x268   :  { %v456_v44 = vpop.permute.xlu1 %455 }
 0x269   :  { %v464_v45 = vadd.f32 %v456_v44, %v1239_v26 }
 0x26b   :  { %v475_v46 = vsel %vm465_vm5, %v464_v45, -inf }
 0x26c   :  { %476 = vmax.xlane.f32.xlu2 %v475_v46 }
 0x2a3   :  { %v468_v47 = vpop.xlane.xlu2 %467 }
 0x2a4   :  { %v478_v48 = vsub.f32 %v461_v36, %v468_v47 }
 0x2a6   :  { %v482_v49 = vmul.f32 1.442695, %v478_v48 }
 0x2a8   :  { %972 = vpow2.f32 %v482_v49 }
 0x2ae   :  { %v973_v50 = vpop.eup %972 }
 0x2af   :  { %v490_v51 = vsel %vm465_vm5, %v973_v50, 0.0 }
 0x2b0   :  { %491 = vadd.xlane.f32.xlu2 %v490_v51 }
 0x2b7   :  { %v471_v52 = vpop.xlane.xlu0 %470 }
 0x2b8   :  { %v479_v53 = vsub.f32 %v462_v39, %v471_v52  ;;  %v592_v39 = vld [vmem:[%s1433_s9] sm:$0x3]  ;;  %v517_v52 = vmul.f32 %v1239_v26, %v1239_v26 }
 0x2b9   :  { %v594_v40 = vperm.slane %v592_v39, 0  ;;  %v595_v41 = vperm.slane %v592_v39, 1 }
 0x2ba   :  { %v484_v54 = vmul.f32 1.442695, %v479_v53 }
 0x2bc   :  { %974 = vpow2.f32 %v484_v54 }
 0x2c2   :  { %v975_v55 = vpop.eup %974 }
 0x2c3   :  { %v493_v56 = vsel %vm465_vm5, %v975_v55, 0.0 }
 0x2c4   :  { %494 = vadd.xlane.f32.xlu0 %v493_v56 }
 0x2d7   :  { %v474_v57 = vpop.xlane.xlu1 %473 }
 0x2d8   :  { %v480_v58 = vsub.f32 %v463_v42, %v474_v57 }
 0x2da   :  { %v486_v59 = vmul.f32 1.442695, %v480_v58 }
 0x2dc   :  { %976 = vpow2.f32 %v486_v59 }
 0x2df   :  { %v477_v60 = vpop.xlane.xlu2 %476 }
 0x2e0   :  { %v481_v61 = vsub.f32 %v464_v45, %v477_v60 }
 0x2e2   :  { %v977_v62 = vpop.eup %976  ;;  %v488_v63 = vmul.f32 1.442695, %v481_v61 }
 0x2e3   :  { %v496_v0 = vsel %vm465_vm5, %v977_v62, 0.0 }
 0x2e4   :  { %978 = vpow2.f32 %v488_v63  ;;  %497 = vadd.xlane.f32.xlu1 %v496_v0  ;;  %v510_v0 = vmul.f32 %v1225_v12, %v1225_v12 }
 0x2ea   :  { %v979_v1 = vpop.eup %978 }
 0x2eb   :  { %v499_v2 = vsel %vm465_vm5, %v979_v1, 0.0 }
 0x2ec   :  { %500 = vadd.xlane.f32.xlu2 %v499_v2 }
 0x2fd   :  { %522 = vrot.lane.b32.xlu1 %v514_v3, %s1012_s5 }
 0x304   :  { %524 = vrot.lane.b32.xlu2 %v515_v4, %s1012_s5  ;;  %v516_v4 = vmul.f32 %v1232_v19, %v1232_v19 }
 0x323   :  { %v492_v21 = vpop.xlane.xlu2 %491 }
 0x324   :  { %980 = vrcp.f32 %v492_v21 }
 0x32a   :  { %v981_v24 = vpop.eup %980 }
 0x32b   :  { %v506_v27 = vmul.f32 %v981_v24, %v973_v50 }
 0x337   :  { %v495_v23 = vpop.xlane.xlu0 %494 }
 0x338   :  { %982 = vrcp.f32 %v495_v23 }
 0x33e   :  { %v983_v25 = vpop.eup %982 }
 0x33f   :  { %v507_v28 = vmul.f32 %v983_v25, %v975_v55 }
 0x341   :  { %v586_v30 = vpack.c.bf16 %v507_v28, %v506_v27  ;;  %v513_v28 = vmul.f32 %v1246_v33, %v1246_v33 }
 0x343   :  { %891 = vmatmul.msk.bf16.vlgmr.msrb.gmra.mxu2 %vm465_vm5, %v586_v30  ;;  %893 = vmatmul.msk.bf16.vlgmr.msrb.gmra.mxu3 %vm465_vm5, %v586_v30 }
 0x357   :  { %v498_v31 = vpop.xlane.xlu1 %497 }
 0x358   :  { %984 = vrcp.f32 %v498_v31 }
 0x35e   :  { %v985_v34 = vpop.eup %984 }
 0x35f   :  { %v501_v32 = vpop.xlane.xlu2 %500  ;;  %v508_v36 = vmul.f32 %v985_v34, %v977_v62 }
 0x360   :  { %986 = vrcp.f32 %v501_v32 }
 0x366   :  { %v987_v35 = vpop.eup %986 }
 0x367   :  { %v509_v37 = vmul.f32 %v987_v35, %v979_v1  ;;  %v525_v25 = vpop.permute.xlu2 %524 }
 0x369   :  { %v587_v38 = vpack.c.bf16 %v509_v37, %v508_v36 }
 0x36b   :  { %892 = vmatmul.msk.bf16.gmra.mxu2 %vm465_vm5, %v587_v38  ;;  %894 = vmatmul.msk.bf16.gmra.mxu3 %vm465_vm5, %v587_v38 }
 0x36f   :  { %v523_v63 = vpop.permute.xlu1 %522 }
 0x370   :  { %v534_v1 = vadd.f32 %v523_v63, %v510_v0 }
 0x372   :  { %v538_v2 = vmul.f32 1.0655568, %v534_v1 }
 0x374   :  { %v542_v3 = vsub.f32 %v538_v2, %v1222_v8 }
 0x3c6   :  { %v633_v42 = vpop.f32.mrf.mxu2  ;;  %v652_v43 = vpop.f32.mrf.mxu3 }
 0x3c7   :  { %v1299_v44 = vadd.f32 %v633_v42, %v594_v40  ;;  %v1301_v45 = vadd.f32 %v652_v43, %v595_v41 }
 0x3c9   :  { %v662_v46 = vmax.f32 %v1299_v44, %v1301_v45 }
 0x3cb   :  { %663 = vmax.xlane.f32.xlu0 %v662_v46 }
 0x3ce   :  { %v635_v47 = vpop.f32.mrf.mxu2  ;;  %v654_v48 = vpop.f32.mrf.mxu3 }
 0x3cf   :  { %v1305_v49 = vadd.f32 %v635_v47, %v594_v40  ;;  %v1307_v50 = vadd.f32 %v654_v48, %v595_v41 }
 0x3d1   :  { %v665_v51 = vmax.f32 %v1305_v49, %v1307_v50 }
 0x3d3   :  { %666 = vmax.xlane.f32.xlu1 %v665_v51 }
 0x3ec   :  { %528 = vrot.lane.b32.xlu1 %v517_v52, %s1012_s5 }
 0x3ee   :  { %v638_v53 = vpop.f32.mrf.mxu2  ;;  %v657_v54 = vpop.f32.mrf.mxu3 }
 0x3ef   :  { %v1314_v55 = vadd.f32 %v638_v53, %v594_v40  ;;  %v1316_v56 = vadd.f32 %v657_v54, %v595_v41  ;;  %v511_v53 = vmul.f32 %v1235_v22, %v1235_v22 }
 0x3f1   :  { %v668_v57 = vmax.f32 %v1314_v55, %v1316_v56  ;;  %v535_v54 = vadd.f32 %v525_v25, %v511_v53 }
 0x3f3   :  { %669 = vmax.xlane.f32.xlu2 %v668_v57 }
 0x3f6   :  { %v640_v58 = vpop.f32.mrf.mxu2  ;;  %v659_v59 = vpop.f32.mrf.mxu3 }
 0x3f7   :  { %v1320_v60 = vadd.f32 %v640_v58, %v594_v40  ;;  %v1322_v61 = vadd.f32 %v659_v59, %v595_v41  ;;  %v512_v58 = vmul.f32 %v1242_v29, %v1242_v29 }
 0x3f9   :  { %v671_v62 = vmax.f32 %v1320_v60, %v1322_v61 }
 0x3fb   :  { %672 = vmax.xlane.f32.xlu0 %v671_v62  ;;  %v539_v62 = vmul.f32 1.0655568, %v535_v54 }
 0x3fd   :  { %v543_v0 = vsub.f32 %v539_v62, %v1229_v15 }
 0x40b   :  { %550 = vrot.lane.b32.xlu2 %v542_v3, %s1013_s18 }
 0x40f   :  { %526 = vrot.lane.b32.xlu0 %v516_v4, %s1012_s5 }
 0x43e   :  { %v1333_v5 = vpop.xlane.xlu0 %663 }
 0x43f   :  { %v674_v6 = vsub.f32 %v1299_v44, %v1333_v5  ;;  %v675_v7 = vsub.f32 %v1301_v45, %v1333_v5 }
 0x441   :  { %v682_v12 = vmul.f32 1.442695, %v674_v6  ;;  %v684_v9 = vmul.f32 1.442695, %v675_v7 }
 0x443   :  { %988 = vpow2.f32 %v682_v12 }
 0x444   :  { %990 = vpow2.f32 %v684_v9  ;;  %v38_v9 = vld [vmem:[%s1427_s0 + $0x10] sm:$0xff] }
 0x446   :  { %v1339_v10 = vpop.xlane.xlu1 %666 }
 0x447   :  { %v676_v11 = vsub.f32 %v1305_v49, %v1339_v10  ;;  %v677_v13 = vsub.f32 %v1307_v50, %v1339_v10 }
 0x449   :  { %v989_v14 = vpop.eup %988  ;;  %v686_v16 = vmul.f32 1.442695, %v676_v11  ;;  %v688_v17 = vmul.f32 1.442695, %v677_v13 }
 0x44a   :  { %v991_v18 = vpop.eup %990 }
 0x44b   :  { %992 = vpow2.f32 %v686_v16  ;;  %v698_v20 = vadd.f32 %v991_v18, %v989_v14  ;;  %v44_v14 = vunpack.c.l.bf16 %v38_v9  ;;  %v45_v16 = vunpack.c.h.bf16 %v38_v9 }
 0x44c   :  { %994 = vpow2.f32 %v688_v17 }
 0x44d   :  { %699 = vadd.xlane.f32.xlu0 %v698_v20 }
 0x451   :  { %v993_v21 = vpop.eup %992 }
 0x452   :  { %v995_v23 = vpop.eup %994 }
 0x453   :  { %v701_v24 = vadd.f32 %v995_v23, %v993_v21 }
 0x455   :  { %702 = vadd.xlane.f32.xlu2 %v701_v24 }
 0x45e   :  { %v529_v27 = vpop.permute.xlu1 %528 }
 0x45f   :  { %v537_v30 = vadd.f32 %v529_v27, %v513_v28 }
 0x461   :  { %v541_v32 = vmul.f32 1.0655568, %v537_v30 }
 0x463   :  { %v545_v38 = vsub.f32 %v541_v32, %v1239_v26 }
 0x466   :  { %v670_v31 = vpop.xlane.xlu2 %669 }
 0x467   :  { %v678_v34 = vsub.f32 %v1314_v55, %v670_v31  ;;  %v679_v35 = vsub.f32 %v1316_v56, %v670_v31 }
 0x469   :  { %v690_v36 = vmul.f32 1.442695, %v678_v34  ;;  %v692_v37 = vmul.f32 1.442695, %v679_v35 }
 0x46b   :  { %996 = vpow2.f32 %v690_v36 }
 0x46c   :  { %998 = vpow2.f32 %v692_v37 }
 0x46d   :  { %556 = vrot.lane.b32.xlu2 %v545_v38, %s1013_s18  ;;  %v37_v38 = vld [vmem:[%s1427_s0 + $0x8] sm:$0xff] }
 0x46e   :  { %v1351_v39 = vpop.xlane.xlu0 %672  ;;  %v551_v2 = vpop.permute.xlu2 %550 }
 0x46f   :  { %v680_v33 = vsub.f32 %v1320_v60, %v1351_v39  ;;  %v681_v40 = vsub.f32 %v1322_v61, %v1351_v39  ;;  %v562_v3 = vsel %vm465_vm5, %v551_v2, 0.0 }
 0x471   :  { %v997_v41 = vpop.eup %996  ;;  %v694_v42 = vmul.f32 1.442695, %v680_v33  ;;  %v696_v43 = vmul.f32 1.442695, %v681_v40 }
 0x472   :  { %v999_v46 = vpop.eup %998 }
 0x473   :  { %1000 = vpow2.f32 %v694_v42  ;;  %v704_v47 = vadd.f32 %v999_v46, %v997_v41  ;;  %v42_v41 = vunpack.c.l.bf16 %v37_v38  ;;  %v43_v42 = vunpack.c.h.bf16 %v37_v38 }
 0x474   :  { %1002 = vpow2.f32 %v696_v43  ;;  %v759_v38 = vsel %vm465_vm5, %v1239_v26, 0.0 }
 0x475   :  { %705 = vadd.xlane.f32.xlu1 %v704_v47 }
 0x479   :  { %v1001_v48 = vpop.eup %1000 }
 0x47a   :  { %v1003_v51 = vpop.eup %1002 }
 0x47b   :  { %v707_v52 = vadd.f32 %v1003_v51, %v1001_v48  ;;  %v39_v51 = vld [vmem:[%s1427_s0 + $0x18] sm:$0xff] }
 0x47d   :  { %708 = vadd.xlane.f32.xlu0 %v707_v52 }
 0x481   :  { %v527_v57 = vpop.permute.xlu0 %526 }
 0x482   :  { %v536_v59 = vadd.f32 %v527_v57, %v512_v58  ;;  %v46_v57 = vunpack.c.l.bf16 %v39_v51  ;;  %v47_v58 = vunpack.c.h.bf16 %v39_v51 }
 0x484   :  { %v540_v63 = vmul.f32 1.0655568, %v536_v59 }
 0x486   :  { %v544_v1 = vsub.f32 %v540_v63, %v1232_v19 }
 0x48e   :  { %552 = vrot.lane.b32.xlu1 %v543_v0, %s1013_s18 }
 0x491   :  { %554 = vrot.lane.b32.xlu0 %v544_v1, %s1013_s18 }
 0x4bb   :  { %563 = vadd.xlane.f32.xlu0 %v562_v3  ;;  %v754_v3 = vlaneseq }
 0x4c0   :  { %v700_v7 = vpop.xlane.xlu0 %699 }
 0x4c8   :  { %v703_v22 = vpop.xlane.xlu2 %702 }
 0x4d0   :  { %v557_v4 = vpop.permute.xlu2 %556 }
 0x4d1   :  { %v571_v6 = vsel %vm465_vm5, %v557_v4, 0.0 }
 0x4d2   :  { %572 = vadd.xlane.f32.xlu0 %v571_v6 }
 0x4e8   :  { %v706_v29 = vpop.xlane.xlu1 %705 }
 0x4e9   :  { %1004 = vlog2.f32 %v706_v29 }
 0x4ea   :  { %1006 = vlog2.f32 %v700_v7  ;;  %v755_v7 = vand.u32 127, %v754_v3 }
 0x4eb   :  { %1008 = vlog2.f32 %v703_v22 }
 0x4ec   :  { %vm760_vm6 = vcmp.eq.s32.totalorder %v755_v7, 32  ;;  %vm765_vm7 = vcmp.eq.s32.totalorder %v755_v7, 33  ;;  %vm770_vm8 = vcmp.eq.s32.totalorder %v755_v7, 34 }
 0x4ef   :  { %v1005_v12 = vpop.eup %1004 }
 0x4f0   :  { %v715_v11 = vmul.f32 0.6931472, %v1005_v12  ;;  %v1007_v17 = vpop.eup %1006  ;;  %v709_v18 = vpop.xlane.xlu0 %708 }
 0x4f1   :  { %v711_v25 = vmul.f32 0.6931472, %v1007_v17  ;;  %1010 = vlog2.f32 %v709_v18  ;;  %v1009_v27 = vpop.eup %1008 }
 0x4f2   :  { %v720_v13 = vadd.f32 %v715_v11, %v670_v31  ;;  %v713_v32 = vmul.f32 0.6931472, %v1009_v27  ;;  %v36_v31 = vld [vmem:[%s1427_s0] sm:$0xff] }
 0x4f3   :  { %v718_v30 = vadd.f32 %v711_v25, %v1333_v5  ;;  %v40_v35 = vunpack.c.l.bf16 %v36_v31  ;;  %v41_v36 = vunpack.c.h.bf16 %v36_v31 }
 0x4f4   :  { %v726_v20 = vsub.f32 %v720_v13, %v1314_v55  ;;  %v727_v21 = vsub.f32 %v720_v13, %v1316_v56  ;;  %v719_v55 = vadd.f32 %v713_v32, %v1339_v10 }
 0x4f5   :  { %v722_v56 = vsub.f32 %v718_v30, %v1299_v44  ;;  %v723_v37 = vsub.f32 %v718_v30, %v1301_v45 }
 0x4f6   :  { %v734_v23 = vmul.f32 %v726_v20, %v44_v14  ;;  %v735_v24 = vmul.f32 %v727_v21, %v45_v16  ;;  %v724_v10 = vsub.f32 %v719_v55, %v1305_v49  ;;  %v725_v44 = vsub.f32 %v719_v55, %v1307_v50 }
 0x4f7   :  { %v1011_v34 = vpop.eup %1010  ;;  %v730_v46 = vmul.f32 %v722_v56, %v40_v35  ;;  %v731_v47 = vmul.f32 %v723_v37, %v41_v36  ;;  %v756_v21 = vsel %vm465_vm5, %v1222_v8, 0.0  ;;  %v757_v8 = vsel %vm465_vm5, %v1229_v15, 0.0 }
 0x4f8   :  { %v744_v28 = vadd.f32 %v735_v24, %v734_v23  ;;  %v717_v33 = vmul.f32 0.6931472, %v1011_v34  ;;  %v732_v53 = vmul.f32 %v724_v10, %v42_v41  ;;  %v733_v54 = vmul.f32 %v725_v44, %v43_v42 }
 0x4f9   :  { %v738_v52 = vadd.f32 %v731_v47, %v730_v46  ;;  %v758_v24 = vsel %vm465_vm5, %v1232_v19, 0.0 }
 0x4fa   :  { %745 = vadd.xlane.f32.xlu0 %v744_v28  ;;  %v721_v45 = vadd.f32 %v717_v33, %v1351_v39  ;;  %v741_v50 = vadd.f32 %v733_v54, %v732_v53 }
 0x4fc   :  { %v728_v59 = vsub.f32 %v721_v45, %v1320_v60  ;;  %v729_v49 = vsub.f32 %v721_v45, %v1322_v61 }
 0x4fe   :  { %v736_v62 = vmul.f32 %v728_v59, %v46_v57  ;;  %v737_v39 = vmul.f32 %v729_v49, %v47_v58 }
 0x500   :  { %v553_v5 = vpop.permute.xlu1 %552  ;;  %v747_v63 = vadd.f32 %v737_v39, %v736_v62 }
 0x501   :  { %v565_v40 = vsel %vm465_vm5, %v553_v5, 0.0 }
 0x502   :  { %566 = vadd.xlane.f32.xlu1 %v565_v40 }
 0x503   :  { %v555_v43 = vpop.permute.xlu0 %554 }
 0x504   :  { %v568_v48 = vsel %vm465_vm5, %v555_v43, 0.0 }
 0x505   :  { %569 = vadd.xlane.f32.xlu2 %v568_v48 }
 0x50a   :  { %739 = vadd.xlane.f32.xlu1 %v738_v52 }
 0x50d   :  { %742 = vadd.xlane.f32.xlu2 %v741_v50 }
 0x512   :  { %748 = vadd.xlane.f32.xlu1 %v747_v63 }
 0x52e   :  { %v564_v0 = vpop.xlane.xlu0 %563 }
 0x52f   :  { %v574_v1 = vadd.f32 -2.0319166, %v564_v0 }
 0x531   :  { %v871_v6 = vadd.f32 -32.0, %v574_v1 }
 0x533   :  { %v582_v61 = vmul.f32 0.5, %v871_v6 }
 0x545   :  { %v573_v22 = vpop.xlane.xlu0 %572 }
 0x546   :  { %v577_v11 = vadd.f32 -2.0319166, %v573_v22 }
 0x548   :  { %v874_v23 = vadd.f32 -32.0, %v577_v11 }
 0x54a   :  { %v585_v55 = vmul.f32 0.5, %v874_v23 }
 0x56d   :  { %v746_v16 = vpop.xlane.xlu0 %745 }
 0x575   :  { %v567_v2 = vpop.xlane.xlu1 %566 }
 0x576   :  { %v575_v4 = vadd.f32 -2.0319166, %v567_v2 }
 0x578   :  { %v570_v29 = vpop.xlane.xlu2 %569  ;;  %v872_v60 = vadd.f32 -32.0, %v575_v4 }
 0x579   :  { %v576_v12 = vadd.f32 -2.0319166, %v570_v29 }
 0x57a   :  { %v583_v18 = vmul.f32 0.5, %v872_v60 }
 0x57b   :  { %v873_v9 = vadd.f32 -32.0, %v576_v12 }
 0x57d   :  { %v584_v13 = vmul.f32 0.5, %v873_v9  ;;  %v740_v14 = vpop.xlane.xlu1 %739 }
 0x57e   :  { %v750_v17 = vadd.f32 %v740_v14, %v582_v61 }
 0x57f   :  { %v752_v20 = vadd.f32 %v746_v16, %v584_v13 }
 0x580   :  { %v761_v25 = vsel %vm760_vm6, %v750_v17, %v756_v21  ;;  %v743_v27 = vpop.xlane.xlu2 %742 }
 0x581   :  { %v763_v28 = vsel %vm760_vm6, %v752_v20, %v758_v24  ;;  %v766_v30 = vsel %vm765_vm7, %v740_v14, %v761_v25  ;;  %v751_v32 = vadd.f32 %v743_v27, %v583_v18 }
 0x582   :  { %v768_v31 = vsel %vm765_vm7, %v746_v16, %v763_v28  ;;  %v771_v34 = vsel %vm770_vm8, %v582_v61, %v766_v30 }
 0x583   :  { %v773_v35 = vsel %vm770_vm8, %v584_v13, %v768_v31  ;;  %775 = vst [vmem:[%s1434_s10] sm:$0xff] %v771_v34  ;;  %v762_v19 = vsel %vm760_vm6, %v751_v32, %v757_v8 }
 0x584   :  { %777 = vst [vmem:[%s1434_s10 + $0x10] sm:$0xff] %v773_v35  ;;  %v767_v36 = vsel %vm765_vm7, %v743_v27, %v762_v19 }
 0x585   :  { %v772_v56 = vsel %vm770_vm8, %v583_v18, %v767_v36  ;;  %v749_v37 = vpop.xlane.xlu1 %748 }
 0x586   :  { %776 = vst [vmem:[%s1434_s10 + $0x8] sm:$0xff] %v772_v56  ;;  %v753_v15 = vadd.f32 %v749_v37, %v585_v55 }
 0x588   :  { %v764_v33 = vsel %vm760_vm6, %v753_v15, %v759_v38 }
 0x589   :  { %v769_v5 = vsel %vm765_vm7, %v749_v37, %v764_v33 }
 0x58a   :  { %v774_v40 = vsel %vm770_vm8, %v585_v55, %v769_v5 }
 0x58b   :  { %778 = vst [vmem:[%s1434_s10 + $0x18] sm:$0xff] %v774_v40 }

</bundles_post_ra>
